<compile_context>
chip_gen: v7x
topology: tpu7x:2x2x1
jax: 0.10.0
libtpu: 0.0.40
codegen_flags: <defaults>
</compile_context>

<pallas_src>
import functools

import jax
import jax.numpy as jnp
from jax.experimental import pallas as pl
from jax.experimental.pallas import tpu as pltpu


def _glu_kernel(x_ref, w_ref, b_ref, o_ref):
    """x:(tm,N)  w:(N,2N) fused [Wa|Wb]  b:(1,2N) f32  o:(tm,N)."""
    n = o_ref.shape[-1]
    # Single fused MXU matmul, f32 accumulation.
    y = jnp.dot(x_ref[...], w_ref[...], preferred_element_type=jnp.float32)
    y = y + b_ref[...]                      # bias add in f32
    a = y[:, :n]                            # Linear_a(x)
    gate = jax.nn.sigmoid(y[:, n:])         # sigmoid(Linear_b(x))  (EUP)
    o_ref[...] = (gate * a).astype(o_ref.dtype)


def _round_up(x, m):
    return ((x + m - 1) // m) * m


def _block_diag(w, r):
    """(D, D) -> block-diagonal (r*D, r*D) with r copies of w."""
    if r == 1:
        return w
    d = w.shape[0]
    eye = jnp.eye(r, dtype=w.dtype)
    return jnp.einsum("ij,kl->ikjl", eye, w).reshape(r * d, r * d)


@functools.partial(jax.jit, static_argnames=("block_m", "compute_dtype"))
def glu_pallas(x, wa, ba, wb, bb, *, block_m=None, compute_dtype=None):
    """GLU forward.  x: (..., D); wa/wb: (D, D) pre-transposed (y = x @ W);
    ba/bb: (D,).  compute_dtype: optional matmul dtype (e.g. jnp.bfloat16)."""
    orig_shape = x.shape
    d = orig_shape[-1]
    assert wa.shape == (d, d) and wb.shape == (d, d)
    out_dtype = x.dtype
    cdt = jnp.dtype(out_dtype) if compute_dtype is None else jnp.dtype(compute_dtype)

    x2 = x.reshape(-1, d)
    m = x2.shape[0]

    # Small-D lane packing factor.
    r = 128 // d if (d < 128 and 128 % d == 0) else 1
    n = r * d

    m_r = _round_up(m, r)
    if m_r != m:
        x2 = jnp.pad(x2, ((0, m_r - m), (0, 0)))
    rows = m_r // r
    xp = x2.reshape(rows, n).astype(cdt)

    # Fused (and, for r > 1, block-diagonal packed) parameters: one (N, 2N)
    # weight and one (1, 2N) bias replace the two separate linears.
    w_fused = jnp.concatenate(
        [_block_diag(wa, r), _block_diag(wb, r)], axis=1).astype(cdt)
    b_fused = jnp.concatenate(
        [jnp.tile(ba, r), jnp.tile(bb, r)]).astype(jnp.float32).reshape(1, 2 * n)

    # Row-tile heuristic: multiple of the sublane pack, capped at 512 so a
    # large M yields a multi-step, pipelined, megacore-shardable grid.
    sub = max(8, 32 // cdt.itemsize)          # 8 for f32, 16 for bf16
    if block_m is None:
        tm = min(512, _round_up(rows, sub))
    else:
        tm = _round_up(block_m, sub)
    tm = max(sub, min(tm, _round_up(rows, sub)))

    rows_p = _round_up(rows, tm)              # pad, never silently truncate
    if rows_p != rows:
        xp = jnp.pad(xp, ((0, rows_p - rows), (0, 0)))
    grid = (rows_p // tm,)

    # VMEM budget: single-buffered weights/bias + double-buffered x/out tiles
    # + f32 intermediates, with headroom.
    cb = cdt.itemsize
    ob = jnp.dtype(out_dtype).itemsize
    need = (
        2 * n * n * cb            # fused weight (single buffer)
        + 2 * n * 4               # fused bias (f32)
        + 2 * tm * n * cb         # x tile, double-buffered
        + 2 * tm * n * ob         # out tile, double-buffered
        + 3 * tm * n * 4          # f32 intermediates (y, gate, a)
    )
    vmem_limit = min(128 * 1024 * 1024, max(32 * 1024 * 1024, need * 3 // 2))
    # TODO(synk): if the fused weight alone exceeds the per-generation VMEM
    # budget (v7x: 64 MiB physical), add an N grid axis over weight columns.

    out = pl.pallas_call(
        _glu_kernel,
        out_shape=jax.ShapeDtypeStruct((rows_p, n), out_dtype),
        grid=grid,
        in_specs=[
            # Streaming rows of x: double-buffered by the BlockSpec pipeline.
            pl.BlockSpec((tm, n), lambda i: (i, 0)),
            # Grid-invariant weights / bias: single-buffered (no VMEM waste).
            pl.BlockSpec((n, 2 * n), lambda i: (0, 0),
                         pipeline_mode=pl.Buffered(1)),
            pl.BlockSpec((1, 2 * n), lambda i: (0, 0),
                         pipeline_mode=pl.Buffered(1)),
        ],
        out_specs=pl.BlockSpec((tm, n), lambda i: (i, 0)),
        compiler_params=pltpu.CompilerParams(
            dimension_semantics=("parallel",),
            vmem_limit_bytes=vmem_limit,
        ),
    )(xp, w_fused, b_fused)

    out = out[:rows].reshape(m_r, d)[:m]
    return out.reshape(orig_shape)


def init_glu_params(key, input_size, dtype=jnp.float32):
    """nn.Linear-style init: W (out, in), b (out,); returns pre-transposed W."""
    k1, k2, k3, k4 = jax.random.split(key, 4)
    bound = 1.0 / jnp.sqrt(input_size)
    wa_pt = jax.random.uniform(k1, (input_size, input_size), dtype, -bound, bound)
    ba = jax.random.uniform(k2, (input_size,), dtype, -bound, bound)
    wb_pt = jax.random.uniform(k3, (input_size, input_size), dtype, -bound, bound)
    bb = jax.random.uniform(k4, (input_size,), dtype, -bound, bound)
    # PyTorch computes x @ W^T; pre-transpose so the kernel does x @ W.
    return wa_pt.T, ba, wb_pt.T, bb


if __name__ == "__main__":
    key = jax.random.PRNGKey(0)
    kx, kp = jax.random.split(key)

    batch, seq, hidden = 2, 8, 32
    x = jax.random.normal(kx, (batch, seq, hidden), dtype=jnp.float32)
    wa, ba, wb, bb = init_glu_params(kp, hidden)

    # Pure-JAX reference of the forward semantics.
    ref = jax.nn.sigmoid(x @ wb + bb) * (x @ wa + ba)

    # f32 path.
    out = jax.block_until_ready(glu_pallas(x, wa, ba, wb, bb))
    assert out.shape == x.shape
    assert jnp.allclose(out, ref, atol=1e-4, rtol=1e-4)

    # bf16 matmul path (f32 accumulate + f32 epilogue), looser tolerance.
    out_bf16 = jax.block_until_ready(
        glu_pallas(x, wa, ba, wb, bb, compute_dtype=jnp.bfloat16))
    assert out_bf16.shape == x.shape
    assert jnp.allclose(out_bf16, ref, atol=5e-2, rtol=5e-2)

    print("KERNEL_OK")
</pallas_src>

<mosaic_0001>
module attributes {stable_mosaic.version = 11 : i64} {
  func.func @_glu_kernel(%arg0: i32, %arg1: memref<8x128xf32, #tpu.memory_space<vmem>>, %arg2: memref<128x256xf32, #tpu.memory_space<vmem>>, %arg3: memref<1x256xf32, #tpu.memory_space<vmem>>, %arg4: memref<8x128xf32, #tpu.memory_space<vmem>>) attributes {dimension_semantics = [#tpu.dimension_semantics<parallel>], iteration_bounds = array<i64: 1>, scalar_prefetch = 0 : i64, scratch_operands = 0 : i64, tpu.core_type = #tpu.core_type<tc>, window_params = [{transform_indices = @transform_0, window_bounds = array<i64: 8, 128>}, {pipeline_mode = #tpu.pipeline_mode<synchronous>, transform_indices = @transform_1, window_bounds = array<i64: 128, 256>}, {pipeline_mode = #tpu.pipeline_mode<synchronous>, transform_indices = @transform_2, window_bounds = array<i64: 1, 256>}, {transform_indices = @transform_3, window_bounds = array<i64: 8, 128>}]} {
    %c0 = arith.constant 0 : index
    %c0_0 = arith.constant 0 : index
    %0 = vector.load %arg1[%c0, %c0_0] : memref<8x128xf32, #tpu.memory_space<vmem>>, vector<8x128xf32>
    %c0_1 = arith.constant 0 : index
    %c0_2 = arith.constant 0 : index
    %1 = vector.load %arg2[%c0_1, %c0_2] : memref<128x256xf32, #tpu.memory_space<vmem>>, vector<128x256xf32>
    %cst = arith.constant dense<0.000000e+00> : vector<8x256xf32>
    %2 = tpu.matmul %0, %1, %cst {dimension_numbers = #tpu.dot_dimension_numbers<[1], [0], [0], [1], [0, 0, 1, 1], [], []>} : vector<8x128xf32>, vector<128x256xf32>, vector<8x256xf32> -> vector<8x256xf32>
    %c0_3 = arith.constant 0 : index
    %c0_4 = arith.constant 0 : index
    %3 = vector.load %arg3[%c0_3, %c0_4] : memref<1x256xf32, #tpu.memory_space<vmem>>, vector<1x256xf32>
    %4 = vector.broadcast %3 : vector<1x256xf32> to vector<8x256xf32>
    %5 = arith.addf %2, %4 : vector<8x256xf32>
    %6 = vector.extract_strided_slice %5 {offsets = [0, 0], sizes = [8, 128], strides = [1, 1]} : vector<8x256xf32> to vector<8x128xf32>
    %7 = vector.extract_strided_slice %5 {offsets = [0, 128], sizes = [8, 128], strides = [1, 1]} : vector<8x256xf32> to vector<8x128xf32>
    %8 = arith.negf %7 : vector<8x128xf32>
    %9 = math.exp %8 : vector<8x128xf32>
    %cst_5 = arith.constant 1.000000e+00 : f32
    %10 = vector.broadcast %cst_5 : f32 to vector<8x128xf32>
    %11 = arith.addf %10, %9 : vector<8x128xf32>
    %12 = arith.divf %10, %11 : vector<8x128xf32>
    %13 = arith.mulf %12, %6 : vector<8x128xf32>
    %c0_6 = arith.constant 0 : index
    %c0_7 = arith.constant 0 : index
    %14 = vector.load %arg4[%c0_6, %c0_7] : memref<8x128xf32, #tpu.memory_space<vmem>>, vector<8x128xf32>
    tpu.vector_store %arg4[%c0_6, %c0_7], %13 {strides = array<i32>} : memref<8x128xf32, #tpu.memory_space<vmem>>, vector<8x128xf32>,
    return
  }
  func.func @transform_0(%arg0: i32) -> (i32, i32) {
    %c0_i32 = arith.constant 0 : i32
    %c0_i32_0 = arith.constant 0 : i32
    return %arg0, %c0_i32 : i32, i32
  }
  func.func @transform_1(%arg0: i32) -> (i32, i32) {
    %c0_i32 = arith.constant 0 : i32
    %c0_i32_0 = arith.constant 0 : i32
    %c0_i32_1 = arith.constant 0 : i32
    return %c0_i32, %c0_i32_0 : i32, i32
  }
  func.func @transform_2(%arg0: i32) -> (i32, i32) {
    %c0_i32 = arith.constant 0 : i32
    %c0_i32_0 = arith.constant 0 : i32
    %c0_i32_1 = arith.constant 0 : i32
    return %c0_i32, %c0_i32_0 : i32, i32
  }
  func.func @transform_3(%arg0: i32) -> (i32, i32) {
    %c0_i32 = arith.constant 0 : i32
    %c0_i32_0 = arith.constant 0 : i32
    return %arg0, %c0_i32 : i32, i32
  }
}

</mosaic_0001>

<bundles_post_ra>
// kernel: tile.13
= control target key start
LH: loop header
LB: loop body
LE: loop exit
PB: predicated region body
PF: predicated region fallthrough
CT: control target
= control target key end

     0   :  { %s22_s0 = inlined_call_operand.vmem [shape: f32[32], index: 0, kind: input, shape index: {}]   ;;  %s23_s1 = inlined_call_operand.vmem [shape: f32[4,32], index: 1, kind: output, shape index: {}]  }
   0x1   :  { %v4_v0 = vld [vmem:[%s22_s0] ss:$0 sm:$0xff] }
   0x2   :  { %5 = vst [vmem:[%s23_s1] sm:$0xf] %v4_v0 }

// kernel: tile.14
= control target key start
LH: loop header
LB: loop body
LE: loop exit
PB: predicated region body
PF: predicated region fallthrough
CT: control target
= control target key end

     0   :  { %vm7_vm0 = vcmask 261120   ;;  %s37_s8 = smov 32   ;;  %s38_s9 = smov 64   ;;  %vm13_vm1 = vcmask 1048320   ;;  %vm19_vm2 = vcmask 785920   ;;  %vm25_vm3 = vcmask 523520   ;;  %s55_s0 = inlined_call_operand.vmem [shape: f32[4,32], index: 0, kind: input, shape index: {}]   ;;  %s56_s1 = inlined_call_operand.vmem [shape: f32[128], index: 1, kind: output, shape index: {}]  }
   0x1   :  { %v4_v0 = vld [vmem:[%s55_s0] sm:$0xf]  ;;  %s36_s0 = smov 96  }
   0x2   :  { %5 = vst [vmem:[#allocation1] sm:$0xf] %v4_v0 }
   0x9   :  { %v10_v1 = vld [vmem:[#allocation1 + $0x3] sm:$0x1]   ;;  %v22_v2 = vld [vmem:[#allocation1 + $0x1] sm:$0x1]   ;;  %v6_v3 = vld [vmem:[#allocation1] sm:$0x1]  }
   0xa   :  { %11 = vrot.lane.b32.xlu0 %v10_v1, %s36_s0  ;;  %23 = vrot.lane.b32.xlu1 %v22_v2, %s37_s8  ;;  %v16_v4 = vld [vmem:[#allocation1 + $0x2] sm:$0x1]   ;;  %8 = vst.msk [vmem:[#allocation0] sm:$0x1] %vm7_vm0, %v6_v3  }
   0xe   :  { %17 = vrot.lane.b32.xlu0 %v16_v4, %s38_s9 }
  0x7c   :  { %v12_v5 = vpop.permute.xlu0 %11   ;;  %v24_v6 = vpop.permute.xlu1 %23  }
  0x7d   :  { %14 = vst.msk [vmem:[#allocation0] sm:$0x1] %vm13_vm1, %v12_v5  }
  0x80   :  { %v18_v7 = vpop.permute.xlu0 %17  }
  0x81   :  { %20 = vst.msk [vmem:[#allocation0] sm:$0x1] %vm19_vm2, %v18_v7  }
  0x82   :  { %26 = vst.msk [vmem:[#allocation0] sm:$0x1] %vm25_vm3, %v24_v6  }
  0x89   :  { %v30_v8 = vld [vmem:[#allocation0] sm:$0x1] }
  0x8a   :  { %32 = vst [vmem:[%s56_s1] sm:$0x1] %v30_v8 }

// kernel: glu_pallas.1
= control target key start
LH: loop header
LB: loop body
LE: loop exit
PB: predicated region body
PF: predicated region fallthrough
CT: control target
= control target key end

     0   :  { %v180_v3 = vmov 0.0   ;;  %v49_v50 = vlaneseq  ;;  %s306_s1 = inlined_call_operand.vmem [shape: f32[128,256], index: 1, kind: input, shape index: {}]   ;;  %s307_s0 = inlined_call_operand.vmem [shape: f32[8,128], index: 0, kind: input, shape index: {}]   ;;  %s308_s2 = inlined_call_operand.vmem [shape: f32[1,256], index: 2, kind: input, shape index: {}]   ;;  %s309_s3 = inlined_call_operand.vmem [shape: f32[8,128], index: 3, kind: output, shape index: {}]  }
   0x1   :  { %v16_v0 = vld [vmem:[%s306_s1 + $0x8] sm:$0xff]  ;;  %v18_v1 = vld [vmem:[%s306_s1 + $0x18] sm:$0xff]  ;;  %v15_v2 = vld [vmem:[%s306_s1] sm:$0xff]  ;;  %123 = vmatprep.mubr.f32.mxu0 %v180_v3 }
   0x2   :  { %v143_v4 = vpack.c.bf16 %v18_v1, %v16_v0  ;;  %v17_v5 = vld [vmem:[%s306_s1 + $0x10] sm:$0xff]  ;;  %v20_v6 = vld [vmem:[%s306_s1 + $0x28] sm:$0xff]  ;;  %v22_v7 = vld [vmem:[%s306_s1 + $0x38] sm:$0xff]  ;;  %v50_v51 = vshrl.u32 %v49_v50, 7 }
   0x3   :  { %v145_v8 = vpack.c.bf16 %v17_v5, %v15_v2  ;;  %v147_v9 = vpack.c.bf16 %v22_v7, %v20_v6  ;;  %v19_v10 = vld [vmem:[%s306_s1 + $0x20] sm:$0xff]  ;;  %v21_v11 = vld [vmem:[%s306_s1 + $0x30] sm:$0xff]  ;;  %v24_v12 = vld [vmem:[%s306_s1 + $0x48] sm:$0xff] }
   0x4   :  { %144 = vmatprep.subr.bf16.mxu0 %v143_v4  ;;  %v26_v13 = vld [vmem:[%s306_s1 + $0x58] sm:$0xff]  ;;  %v149_v14 = vpack.c.bf16 %v21_v11, %v19_v10  ;;  %v23_v16 = vld [vmem:[%s306_s1 + $0x40] sm:$0xff]  ;;  %v25_v17 = vld [vmem:[%s306_s1 + $0x50] sm:$0xff]  ;;  %v55_v52 = vsub.s32 1, %v50_v51  ;;  %v51_v61 = vsub.s32 0, %v50_v51 }
   0x5   :  { %146 = vmatpush1.bf16.msra.mxu0 %v145_v8  ;;  %v151_v15 = vpack.c.bf16 %v26_v13, %v24_v12  ;;  %v28_v18 = vld [vmem:[%s306_s1 + $0x68] sm:$0xff]  ;;  %v30_v19 = vld [vmem:[%s306_s1 + $0x78] sm:$0xff]  ;;  %v153_v20 = vpack.c.bf16 %v25_v17, %v23_v16  ;;  %v27_v22 = vld [vmem:[%s306_s1 + $0x60] sm:$0xff] }
   0x6   :  { %148 = vmatprep.subr.bf16.mxu0 %v147_v9  ;;  %v155_v21 = vpack.c.bf16 %v30_v19, %v28_v18  ;;  %v29_v23 = vld [vmem:[%s306_s1 + $0x70] sm:$0xff]  ;;  %v32_v24 = vld [vmem:[%s306_s1 + $0x88] sm:$0xff]  ;;  %v34_v25 = vld [vmem:[%s306_s1 + $0x98] sm:$0xff] }
   0x7   :  { %v157_v26 = vpack.c.bf16 %v29_v23, %v27_v22  ;;  %v159_v27 = vpack.c.bf16 %v34_v25, %v32_v24  ;;  %v31_v28 = vld [vmem:[%s306_s1 + $0x80] sm:$0xff]  ;;  %v33_v29 = vld [vmem:[%s306_s1 + $0x90] sm:$0xff]  ;;  %v36_v30 = vld [vmem:[%s306_s1 + $0xa8] sm:$0xff] }
   0x8   :  { %v38_v31 = vld [vmem:[%s306_s1 + $0xb8] sm:$0xff]  ;;  %v161_v32 = vpack.c.bf16 %v33_v29, %v31_v28  ;;  %v35_v34 = vld [vmem:[%s306_s1 + $0xa0] sm:$0xff]  ;;  %v37_v35 = vld [vmem:[%s306_s1 + $0xb0] sm:$0xff] }
   0x9   :  { %150 = vmatpush1.bf16.msra.mxu0 %v149_v14  ;;  %v163_v33 = vpack.c.bf16 %v38_v31, %v36_v30  ;;  %v40_v36 = vld [vmem:[%s306_s1 + $0xc8] sm:$0xff]  ;;  %v42_v37 = vld [vmem:[%s306_s1 + $0xd8] sm:$0xff]  ;;  %v165_v38 = vpack.c.bf16 %v37_v35, %v35_v34  ;;  %v39_v40 = vld [vmem:[%s306_s1 + $0xc0] sm:$0xff] }
   0xa   :  { %152 = vmatprep.subr.bf16.mxu0 %v151_v15  ;;  %v167_v39 = vpack.c.bf16 %v42_v37, %v40_v36  ;;  %v41_v41 = vld [vmem:[%s306_s1 + $0xd0] sm:$0xff]  ;;  %v44_v42 = vld [vmem:[%s306_s1 + $0xe8] sm:$0xff]  ;;  %v46_v43 = vld [vmem:[%s306_s1 + $0xf8] sm:$0xff] }
   0xb   :  { %v169_v44 = vpack.c.bf16 %v41_v41, %v39_v40  ;;  %v171_v45 = vpack.c.bf16 %v46_v43, %v44_v42  ;;  %v43_v46 = vld [vmem:[%s306_s1 + $0xe0] sm:$0xff]  ;;  %v45_v47 = vld [vmem:[%s306_s1 + $0xf0] sm:$0xff] }
   0xc   :  { %v173_v48 = vpack.c.bf16 %v45_v47, %v43_v46  ;;  %v14_v49 = vld [vmem:[%s307_s0] sm:$0xff] }
   0xd   :  { %154 = vmatpush1.bf16.msra.mxu0 %v153_v20  ;;  %v47_v53 = vld [vmem:[%s308_s2] sm:$0x3] }
   0xe   :  { %156 = vmatprep.subr.bf16.mxu0 %v155_v21  ;;  %v56_v54 = vrot.slane %v47_v53, %v55_v52  ;;  %v52_v62 = vrot.slane %v47_v53, %v51_v61 }
  0x11   :  { %158 = vmatpush1.bf16.msra.mxu0 %v157_v26 }
  0x12   :  { %160 = vmatprep.subr.bf16.mxu0 %v159_v27 }
  0x15   :  { %162 = vmatpush1.bf16.msra.mxu0 %v161_v32 }
  0x16   :  { %164 = vmatprep.subr.bf16.mxu0 %v163_v33 }
  0x19   :  { %166 = vmatpush1.bf16.msra.mxu0 %v165_v38 }
  0x1a   :  { %168 = vmatprep.subr.bf16.mxu0 %v167_v39 }
  0x1d   :  { %170 = vmatpush1.bf16.msra.mxu0 %v169_v44 }
  0x1e   :  { %172 = vmatprep.subr.bf16.mxu0 %v171_v45 }
  0x21   :  { %174 = vmatpush1.bf16.msra.mxu0 %v173_v48 }
  0x24   :  { %124 = vmatmul.mubr.f32.vlgmr.msra.gmra.mrb[0].mxu0 %v14_v49 }
  0xf7   :  { %v125_v55 = vpop.f32.mrb[0].mxu0 }
  0xf8   :  { %v127_v56 = vpop.f32.mrb[1].mxu0  ;;  %v126_v63 = vadd.f32 %v125_v55, %v52_v62 }
  0xf9   :  { %v128_v57 = vadd.f32 %v127_v56, %v56_v54 }
  0xfb   :  { %v142_v58 = vmul.f32 -1.442695, %v128_v57 }
  0xfd   :  { %176 = vpow2.f32 %v142_v58 }
 0x107   :  { %v177_v59 = vpop.eup %176 }
 0x108   :  { %v133_v60 = vadd.f32 1.0, %v177_v59 }
 0x10a   :  { %178 = vrcp.f32 %v133_v60 }
 0x114   :  { %v179_v0 = vpop.eup %178 }
 0x115   :  { %v136_v1 = vmul.f32 %v179_v0, %v126_v63 }
 0x117   :  { %137 = vst [vmem:[%s309_s3] sm:$0xff] %v136_v1 }

</bundles_post_ra>
